<compile_context>
chip_gen: v5e
topology: v5e:2x2
jax: 0.10.0
libtpu: 0.0.40
codegen_flags: <defaults>
</compile_context>

<pallas_src>
import math

import jax
import jax.numpy as jnp
from jax.experimental import pallas as pl
from jax.experimental.pallas import tpu as pltpu


# Slabs at or below this size run as a single grid step; anything bigger gets a
# multi-step parallel grid so both TensorCores on v7x can be used.
_SINGLE_BLOCK_BYTES = 512 * 1024


def _tpu_budgets():
    """(tile_bytes, vmem_limit_bytes) tuned per TPU generation."""
    vmem_cap = 128 * 1024 * 1024
    try:
        info = pltpu.get_tpu_info()
        vmem_cap = int(getattr(info, "vmem_capacity_bytes", vmem_cap))
    except Exception:
        pass
    if vmem_cap <= 64 * 1024 * 1024:
        # v7x-class: ~3.2 TB/s HBM per TC -> bigger tiles keep the ~0.35 us/step
        # pipeline overhead <10%; needs an explicit scoped-VMEM raise.
        return 6 * 1024 * 1024, 48 * 1024 * 1024
    # v5e / v6e: 2 MiB tiles already sit near the elementwise HBM roofline.
    # Pass the limit explicitly (v5e's default scoped VMEM is only 16 MiB).
    return 2 * 1024 * 1024, 24 * 1024 * 1024


def _bias_relu_kernel(x_ref, b_ref, o_ref):
    # Lane/sublane-dense tiles. b_ref either row-matches x_ref exactly or is a
    # single bias-period row (1, lanes); the sublane broadcast is free filler
    # for a memory-bound op. Scalar-immediate ReLU: one VPU max, no zeros tile.
    o_ref[...] = jnp.maximum(x_ref[...] + b_ref[...], 0.0)


def make_bias_relu(bias, x_shape, dtype=jnp.float32):
    """Builds relu(x + bias) for x:(N,C,H,W), bias:(C,H,W) (PyTorch broadcast).

    All layout decisions and the (small) bias replication are hoisted here,
    out of the per-call jit path. Returns a jitted callable f(x) -> (N,C,H,W).
    """
    N, C, H, W = x_shape
    assert bias.shape == (C, H, W)
    HW = H * W
    P = C * HW
    itemsize = jnp.dtype(dtype).itemsize
    tile_bytes, vmem_limit = _tpu_budgets()

    # ---- Lane-dense 2-D view of x -----------------------------------------
    # Preferred: (N*C, H*W) with the batch folded onto sublanes (fully packed
    # f32 vregs, unmasked stores). If H*W is not a multiple of 128 (14*14,
    # 7*7, ...), fall back to (N, C*H*W): one full bias period per row,
    # lane-blocked in multiples of 128.
    if HW % 128 == 0:
        R, L = N * C, HW
        row_unit = min(R, (C * 8) // math.gcd(C, 8))   # whole images, 8-sublane
        replicate_bias = True
    else:
        R, L = N, P
        row_unit = min(R, 8)
        replicate_bias = False

    # ---- Block sizes --------------------------------------------------------
    total_bytes = R * L * itemsize
    block_budget = min(tile_bytes, max(_SINGLE_BLOCK_BYTES, (total_bytes + 1) // 2))
    max_block_elems = max(128, block_budget // itemsize)

    base_rows = min(row_unit, R)
    if base_rows * L > max_block_elems and L > 128:
        # One row-unit at full lane width would blow the tile budget (large H*W
        # with small/odd C): split the lane axis onto a second grid dimension.
        lane_block = min(L, max(128, (max_block_elems // base_rows) // 128 * 128))
    else:
        lane_block = L

    if R <= row_unit:
        rows_per_block = R
    else:
        k = max(1, max_block_elems // (row_unit * lane_block))
        rows_per_block = max(row_unit, min(k, R // row_unit) * row_unit)

    grid = (pl.cdiv(R, rows_per_block), pl.cdiv(L, lane_block))

    # ---- Bias operand: built once here, constant block index in the call ----
    if replicate_bias:
        reps = rows_per_block // C
        bias_arr = jnp.broadcast_to(
            jnp.asarray(bias, dtype).reshape(1, C, HW), (reps, C, HW)
        ).reshape(rows_per_block, HW)
        bias_block = (rows_per_block, lane_block)
    else:
        bias_arr = jnp.asarray(bias, dtype).reshape(1, P)
        bias_block = (1, lane_block)

    cost = pl.CostEstimate(
        flops=2 * N * P,                                    # add + max
        transcendentals=0,
        bytes_accessed=2 * N * P * itemsize + bias_arr.size * itemsize,
    )

    call = pl.pallas_call(
        _bias_relu_kernel,
        out_shape=jax.ShapeDtypeStruct((R, L), dtype),
        grid=grid,
        in_specs=[
            pl.BlockSpec((rows_per_block, lane_block), lambda i, j: (i, j)),
            pl.BlockSpec(bias_block, lambda i, j: (0, j)),  # constant -> resident
        ],
        out_specs=pl.BlockSpec((rows_per_block, lane_block), lambda i, j: (i, j)),
        input_output_aliases={0: 0},                        # in-place, same shape
        compiler_params=pltpu.CompilerParams(
            dimension_semantics=("parallel", "parallel"),   # megacore-splittable
            vmem_limit_bytes=vmem_limit,
        ),
        cost_estimate=cost,
    )

    @jax.jit
    def forward(x):
        out2 = call(x.reshape(R, L).astype(dtype), bias_arr)
        return out2.reshape(N, C, H, W)

    return forward


# ---------------------------------------------------------------------------
# Fused classifier head: xm = fc2(relu(bn(fc1(xm)))) with 1x1 convs == matmuls.
# The bias+ReLU epilogue runs INSIDE the producer matmul (review item 1) —
# BatchNorm (eval mode) is folded into fc1's weight/bias in the wrapper.
# ---------------------------------------------------------------------------
def _fc_head_kernel(x_ref, w1_ref, b1_ref, w2_ref, b2_ref, o_ref):
    h = jnp.dot(x_ref[...], w1_ref[...],
                preferred_element_type=jnp.float32,
                precision=jax.lax.Precision.HIGHEST)
    h = jnp.maximum(h + b1_ref[...], 0.0)                  # fused bias+ReLU epilogue
    o = jnp.dot(h.astype(w2_ref.dtype), w2_ref[...],
                preferred_element_type=jnp.float32,
                precision=jax.lax.Precision.HIGHEST)
    o_ref[...] = (o + b2_ref[...]).astype(o_ref.dtype)


def classifier_head_forward(x, w1, b1, bn_gamma, bn_beta, bn_mean, bn_var,
                            w2, b2, eps=1e-5):
    """x:(N,F1) features -> (N,F3) logits.  Single-block kernel for the small
    head; larger N would tile rows with the epilogue in the finalize branch."""
    N, _ = x.shape
    F2 = w1.shape[1]
    F3 = w2.shape[1]
    s = bn_gamma / jnp.sqrt(bn_var + eps)
    w1_eff = w1 * s[None, :]
    b1_eff = (b1 - bn_mean) * s + bn_beta
    return pl.pallas_call(
        _fc_head_kernel,
        out_shape=jax.ShapeDtypeStruct((N, F3), x.dtype),
        in_specs=[pl.BlockSpec(memory_space=pltpu.MemorySpace.VMEM)] * 5,
        out_specs=pl.BlockSpec(memory_space=pltpu.MemorySpace.VMEM),
    )(x, w1_eff, b1_eff.reshape(1, F2), w2, b2.reshape(1, F3))


if __name__ == "__main__":
    key = jax.random.PRNGKey(0)
    (kx, kb, kh, kw1, kb1, kw2, kb2, kg, kbt, km, kv) = jax.random.split(key, 11)

    # --- standalone bias + ReLU (NCHW broadcast) -----------------------------
    N, C, H, W = 2, 4, 16, 16
    x = jax.random.normal(kx, (N, C, H, W), dtype=jnp.float32)
    bias = jax.random.normal(kb, (C, H, W), dtype=jnp.float32) * 0.1

    bias_relu = make_bias_relu(bias, (N, C, H, W))
    out = jax.block_until_ready(bias_relu(x))
    ref = jnp.maximum(x + bias[None], 0.0)
    assert out.shape == (N, C, H, W)
    assert jnp.allclose(out, ref, atol=1e-6, rtol=1e-6)

    # --- fused classifier head: relu(bn(fc1(x))) -> fc2 ----------------------
    F1, F2, F3 = 32, 32, 10
    xh = jax.random.normal(kh, (N, F1), dtype=jnp.float32)
    w1 = jax.random.normal(kw1, (F1, F2), dtype=jnp.float32) * 0.1
    b1 = jax.random.normal(kb1, (F2,), dtype=jnp.float32) * 0.1
    w2 = jax.random.normal(kw2, (F2, F3), dtype=jnp.float32) * 0.1
    b2 = jax.random.normal(kb2, (F3,), dtype=jnp.float32) * 0.1
    gamma = jax.random.normal(kg, (F2,), dtype=jnp.float32) * 0.1 + 1.0
    beta = jax.random.normal(kbt, (F2,), dtype=jnp.float32) * 0.1
    mean = jax.random.normal(km, (F2,), dtype=jnp.float32) * 0.1
    var = jax.random.uniform(kv, (F2,), dtype=jnp.float32) + 0.5

    head = jax.block_until_ready(
        jax.jit(classifier_head_forward)(xh, w1, b1, gamma, beta, mean, var, w2, b2))
    s = gamma / jnp.sqrt(var + 1e-5)
    h_ref = jnp.maximum(
        jnp.dot(xh, w1, precision="highest") + (b1 - mean) * s + beta * 0.0
        + (beta - (b1 - mean) * 0.0) * 0.0, 0.0)  # placeholder, replaced below
    h_ref = jnp.maximum((jnp.dot(xh, w1, precision="highest") + b1 - mean) * s + beta, 0.0)
    head_ref = jnp.dot(h_ref, w2, precision="highest") + b2
    assert head.shape == (N, F3)
    assert jnp.allclose(head, head_ref, atol=1e-4, rtol=1e-4)

    print("KERNEL_OK")
</pallas_src>

<mosaic_0001>
module attributes {stable_mosaic.version = 11 : i64} {
  func.func @_bias_relu_kernel(%arg0: i32, %arg1: i32, %arg2: memref<8x256xf32, #tpu.memory_space<vmem>>, %arg3: memref<8x256xf32, #tpu.memory_space<vmem>>, %arg4: memref<8x256xf32, #tpu.memory_space<vmem>>) attributes {dimension_semantics = [#tpu.dimension_semantics<parallel>, #tpu.dimension_semantics<parallel>], iteration_bounds = array<i64: 1, 1>, scalar_prefetch = 0 : i64, scratch_operands = 0 : i64, tpu.core_type = #tpu.core_type<tc>, window_params = [{transform_indices = @transform_0, window_bounds = array<i64: 8, 256>}, {transform_indices = @transform_1, window_bounds = array<i64: 8, 256>}, {transform_indices = @transform_2, window_bounds = array<i64: 8, 256>}]} {
    %c0 = arith.constant 0 : index
    %c0_0 = arith.constant 0 : index
    %0 = vector.load %arg2[%c0, %c0_0] : memref<8x256xf32, #tpu.memory_space<vmem>>, vector<8x256xf32>
    %c0_1 = arith.constant 0 : index
    %c0_2 = arith.constant 0 : index
    %1 = vector.load %arg3[%c0_1, %c0_2] : memref<8x256xf32, #tpu.memory_space<vmem>>, vector<8x256xf32>
    %2 = arith.addf %0, %1 : vector<8x256xf32>
    %cst = arith.constant 0.000000e+00 : f32
    %3 = vector.broadcast %cst : f32 to vector<8x256xf32>
    %4 = arith.maximumf %2, %3 : vector<8x256xf32>
    %c0_3 = arith.constant 0 : index
    %c0_4 = arith.constant 0 : index
    %5 = vector.load %arg4[%c0_3, %c0_4] : memref<8x256xf32, #tpu.memory_space<vmem>>, vector<8x256xf32>
    tpu.vector_store %arg4[%c0_3, %c0_4], %4 {strides = array<i32>} : memref<8x256xf32, #tpu.memory_space<vmem>>, vector<8x256xf32>,
    return
  }
  func.func @transform_0(%arg0: i32, %arg1: i32) -> (i32, i32) {
    %c0_i32 = arith.constant 0 : i32
    return %arg0, %arg1 : i32, i32
  }
  func.func @transform_1(%arg0: i32, %arg1: i32) -> (i32, i32) {
    %c0_i32 = arith.constant 0 : i32
    %c0_i32_0 = arith.constant 0 : i32
    return %c0_i32, %arg1 : i32, i32
  }
  func.func @transform_2(%arg0: i32, %arg1: i32) -> (i32, i32) {
    %c0_i32 = arith.constant 0 : i32
    return %arg0, %arg1 : i32, i32
  }
}

</mosaic_0001>

<bundles_post_ra>
// kernel: forward.1
= control target key start
LH: loop header
LB: loop body
LE: loop exit
PB: predicated region body
PF: predicated region fallthrough
CT: control target
= control target key end

     0   :  { %s58_s0 = inlined_call_operand.vmem [shape: f32[8,256], index: 0, kind: input, shape index: {}, may-alias: {0,2}]   ;;  %s59_s1 = inlined_call_operand.vmem [shape: f32[8,256], index: 1, kind: input, shape index: {}]   ;;  %s60_s2 = inlined_call_operand.vmem [shape: f32[8,256], index: 2, kind: output, shape index: {}, may-alias: {0,2}]  }
   0x1   :  { %v11_v0 = vld [vmem:[%s58_s0] sm:$0xff]  ;;  %v12_v2 = vld [vmem:[%s58_s0 + $0x8] sm:$0xff] }
   0x2   :  { %v13_v1 = vld [vmem:[%s59_s1] sm:$0xff]  ;;  %v14_v4 = vld [vmem:[%s59_s1 + $0x8] sm:$0xff] }
   0x3   :  { %v15_v3 = vadd.f32 %v13_v1, %v11_v0  ;;  %v16_v5 = vadd.f32 %v14_v4, %v12_v2 }
   0x5   :  { %v17_v6 = vmax.f32 %v15_v3, 0.0  ;;  %v18_v7 = vmax.f32 %v16_v5, 0.0 }
   0x7   :  { %19 = vst [vmem:[%s60_s2] sm:$0xff] %v17_v6 }
   0x8   :  { %20 = vst [vmem:[%s60_s2 + $0x8] sm:$0xff] %v18_v7 }

</bundles_post_ra>
